<compile_context>
chip_gen: v7x
topology: tpu7x:2x2x1
jax: 0.10.0
libtpu: 0.0.40
codegen_flags: <defaults>
</compile_context>

<pallas_src>
import functools

import jax
import jax.numpy as jnp
import numpy as np
from jax.experimental import pallas as pl
from jax.experimental.pallas import tpu as pltpu


def _round_up(x, m):
    return (x + m - 1) // m * m


def _compute_ad(a_ref, d, chunk):
    """Ad[b, m] = sum_n A[b, m, n] * d[b, n]  (per-batch A @ d, row layout).

    Computed in sublane chunks so the (chunk, N, N) broadcast-multiply
    temporary stays small (no vreg spills when the batch tile is large)."""
    tb, _ = d.shape
    parts = []
    c0 = 0
    while c0 < tb:
        sz = min(chunk, tb - c0)
        a_c = a_ref[pl.ds(c0, sz), :, :]          # (sz, N, N)
        d_c = d[c0:c0 + sz]                       # (sz, N)
        parts.append(jnp.sum(a_c * d_c[:, None, :], axis=-1))
        c0 += sz
    return parts[0] if len(parts) == 1 else jnp.concatenate(parts, axis=0)


def _lcg_m_kernel(w_d_ref, alpha_t_ref, s_ref, r_ref, d_ref, a_ref, out_ref,
                  *, n, ad_chunk):
    s = s_ref[...]                                # (TB, N)
    r = r_ref[...]
    d = d_ref[...]
    w_d = w_d_ref[...]                            # (N, 2N) = [alpha^T | beta^T]
    alpha_t = alpha_t_ref[...]                    # (N, N)  = alpha^T

    Ad = _compute_ad(a_ref, d, ad_chunk)          # (TB, N)

    # One fused MXU matmul gives both alpha@d and beta@d (row form: d @ W).
    ab_d = jnp.dot(d, w_d, preferred_element_type=jnp.float32)   # (TB, 2N)
    alpha_d = ab_d[:, :n]
    beta_d = ab_d[:, n:]
    alpha_Ad = jnp.dot(Ad, alpha_t, preferred_element_type=jnp.float32)

    s_n = s + alpha_d
    r_n = r - alpha_Ad
    d_n = r_n + beta_d
    out_ref[...] = jnp.concatenate([s_n, r_n, d_n], axis=-1).astype(out_ref.dtype)


def _lcg_v_kernel(alpha_ref, beta_ref, s_ref, r_ref, d_ref, a_ref, out_ref,
                  *, ad_chunk):
    alpha = alpha_ref[...]                        # (1, N) row, broadcast over batch
    beta = beta_ref[...]
    s = s_ref[...]
    r = r_ref[...]
    d = d_ref[...]

    Ad = _compute_ad(a_ref, d, ad_chunk)

    s_n = s + alpha * d
    r_n = r - alpha * Ad
    d_n = r_n + beta * d
    out_ref[...] = jnp.concatenate([s_n, r_n, d_n], axis=-1).astype(out_ref.dtype)


def _lcg_s_kernel(ab_ref, s_ref, r_ref, d_ref, a_ref, out_ref, *, ad_chunk):
    alpha = ab_ref[0]                             # scalars from SMEM
    beta = ab_ref[1]
    s = s_ref[...]
    r = r_ref[...]
    d = d_ref[...]

    Ad = _compute_ad(a_ref, d, ad_chunk)

    s_n = s + alpha * d
    r_n = r - alpha * Ad
    d_n = r_n + beta * d
    out_ref[...] = jnp.concatenate([s_n, r_n, d_n], axis=-1).astype(out_ref.dtype)


_TILE_B_CAP = 256                      # vreg/VMEM-friendly batch tile at small N
_A_BLOCK_BYTES_CAP = 4 * 1024 * 1024   # keep the double-buffered A tile modest


def lcg_forward(svm, alpha, beta, s, r, d, A, *, tile_b=None):
    """Pallas equivalent of Lcg.forward(s, r, d, A).

    s, r, d: (B, N, 1); A: (B, N, N). Returns (s_next, r_next, d_next) with
    the same (B, N, 1) column-vector convention as the PyTorch module."""
    B, N, _ = s.shape
    dtype = s.dtype

    # row layout (batch on sublanes, feature on lanes)
    s2, r2, d2 = s[..., 0], r[..., 0], d[..., 0]
    A_p = A

    # ---- batch tiling: grid over B so Pallas double-buffers the A DMA ----
    if tile_b is None:
        tile_b = min(_TILE_B_CAP, _round_up(B, 8))
        tile_b = min(tile_b,
                     max(8, (_A_BLOCK_BYTES_CAP // (N * N * 4)) // 8 * 8))
    tile_b = max(8, _round_up(int(tile_b), 8))
    b_pad = _round_up(B, tile_b)
    if b_pad != B:
        pad = ((0, b_pad - B),)
        s2 = jnp.pad(s2, pad + ((0, 0),))
        r2 = jnp.pad(r2, pad + ((0, 0),))
        d2 = jnp.pad(d2, pad + ((0, 0),))
        A_p = jnp.pad(A, pad + ((0, 0), (0, 0)))

    # chunk for the Ad reduction: bound the (chunk, N, N) f32 temp to ~128 KiB
    ad_chunk = max(8, min(tile_b, ((32 * 1024) // max(N * N, 1)) // 8 * 8))

    vec_spec = pl.BlockSpec((tile_b, N), lambda i: (i, 0))
    a_spec = pl.BlockSpec((tile_b, N, N), lambda i: (i, 0, 0))
    out_spec = pl.BlockSpec((tile_b, 3 * N), lambda i: (i, 0))

    def const_spec(shape):
        return pl.BlockSpec(shape, lambda i, _n=len(shape): (0,) * _n)

    if svm == 'm':
        # Pre-transpose on the host side and fuse alpha^T|beta^T so the two
        # d-contractions become a single MXU matmul with a 2N-wide output.
        alpha_t = jnp.transpose(alpha)                                # (N, N)
        w_d = jnp.concatenate([alpha_t, jnp.transpose(beta)], axis=1)  # (N, 2N)
        kernel = functools.partial(_lcg_m_kernel, n=N, ad_chunk=ad_chunk)
        in_specs = [const_spec((N, 2 * N)), const_spec((N, N)),
                    vec_spec, vec_spec, vec_spec, a_spec]
        args = (w_d, alpha_t, s2, r2, d2, A_p)
    elif svm == 'v':
        a_row = alpha.reshape(1, N)        # (N,1) column -> (1,N) row
        b_row = beta.reshape(1, N)
        kernel = functools.partial(_lcg_v_kernel, ad_chunk=ad_chunk)
        in_specs = [const_spec((1, N)), const_spec((1, N)),
                    vec_spec, vec_spec, vec_spec, a_spec]
        args = (a_row, b_row, s2, r2, d2, A_p)
    elif svm == 's':
        # true scalars live in SMEM: no broadcast HBM array, no padded DMA
        ab = jnp.concatenate([alpha.reshape(1),
                              beta.reshape(1)]).astype(jnp.float32)   # (2,)
        kernel = functools.partial(_lcg_s_kernel, ad_chunk=ad_chunk)
        in_specs = [pl.BlockSpec(memory_space=pltpu.MemorySpace.SMEM),
                    vec_spec, vec_spec, vec_spec, a_spec]
        args = (ab, s2, r2, d2, A_p)
    else:
        raise Exception('only s v m not {}'.format(svm))

    out = pl.pallas_call(
        kernel,
        grid=(b_pad // tile_b,),
        in_specs=in_specs,
        out_specs=out_spec,
        out_shape=jax.ShapeDtypeStruct((b_pad, 3 * N), dtype),
        compiler_params=pltpu.CompilerParams(
            dimension_semantics=("parallel",)),
    )(*args)

    out = out[:B]
    # back to PyTorch column-vector convention (B, N, 1)
    s_n = out[:, 0 * N:1 * N][..., None]
    r_n = out[:, 1 * N:2 * N][..., None]
    d_n = out[:, 2 * N:3 * N][..., None]
    return s_n, r_n, d_n


def lcg_reference(svm, alpha, beta, s, r, d, A):
    """Pure-JAX transcription of the PyTorch forward (for verification)."""
    if svm == 'm':
        s_next = s + alpha @ d
        r_next = r - alpha @ (A @ d)
        d_next = r_next + beta @ d
    else:
        s_next = s + alpha * d
        r_next = r - alpha * (A @ d)
        d_next = r_next + beta * d
    return s_next, r_next, d_next


if __name__ == "__main__":
    # Small shapes consistent with the module: n_t = 16 -> N = 2*n_t = 32, B = 2.
    n_t, B = 16, 2
    N = 2 * n_t
    key = jax.random.PRNGKey(0)
    ks = jax.random.split(key, 8)

    s = jax.random.normal(ks[0], (B, N, 1), dtype=jnp.float32)
    r = jax.random.normal(ks[1], (B, N, 1), dtype=jnp.float32)
    d = jax.random.normal(ks[2], (B, N, 1), dtype=jnp.float32)
    A = jax.random.normal(ks[3], (B, N, N), dtype=jnp.float32)

    # Lcg.reset_parameters() zeroes alpha/beta; use small non-zero values so the
    # matmul paths are actually exercised.
    params = {
        'm': (0.1 * jax.random.normal(ks[4], (N, N), dtype=jnp.float32),
              0.1 * jax.random.normal(ks[5], (N, N), dtype=jnp.float32)),
        'v': (0.1 * jax.random.normal(ks[6], (N, 1), dtype=jnp.float32),
              0.1 * jax.random.normal(ks[7], (N, 1), dtype=jnp.float32)),
        's': (jnp.array([0.3], dtype=jnp.float32),
              jnp.array([-0.2], dtype=jnp.float32)),
    }

    for svm in ('m', 'v', 's'):
        alpha, beta = params[svm]
        outs = jax.block_until_ready(lcg_forward(svm, alpha, beta, s, r, d, A))
        refs = lcg_reference(svm, alpha, beta, s, r, d, A)
        for o, ref in zip(outs, refs):
            assert o.shape == ref.shape and o.dtype == ref.dtype
            np.testing.assert_allclose(np.asarray(o), np.asarray(ref),
                                       rtol=1e-5, atol=1e-5)

    # Also exercise batch padding + a multi-step (software-pipelined) grid.
    B2 = 20
    kb = jax.random.split(jax.random.PRNGKey(1), 4)
    s_b = jax.random.normal(kb[0], (B2, N, 1), dtype=jnp.float32)
    r_b = jax.random.normal(kb[1], (B2, N, 1), dtype=jnp.float32)
    d_b = jax.random.normal(kb[2], (B2, N, 1), dtype=jnp.float32)
    A_b = jax.random.normal(kb[3], (B2, N, N), dtype=jnp.float32)
    alpha_m, beta_m = params['m']
    outs = jax.block_until_ready(
        lcg_forward('m', alpha_m, beta_m, s_b, r_b, d_b, A_b, tile_b=8))
    refs = lcg_reference('m', alpha_m, beta_m, s_b, r_b, d_b, A_b)
    for o, ref in zip(outs, refs):
        np.testing.assert_allclose(np.asarray(o), np.asarray(ref),
                                   rtol=1e-5, atol=1e-5)

    print("KERNEL_OK")
</pallas_src>

<mosaic_0001>
module attributes {stable_mosaic.version = 11 : i64} {
  func.func @_lcg_m_kernel(%arg0: i32, %arg1: memref<32x64xf32, #tpu.memory_space<vmem>>, %arg2: memref<32x32xf32, #tpu.memory_space<vmem>>, %arg3: memref<8x32xf32, #tpu.memory_space<vmem>>, %arg4: memref<8x32xf32, #tpu.memory_space<vmem>>, %arg5: memref<8x32xf32, #tpu.memory_space<vmem>>, %arg6: memref<8x32x32xf32, #tpu.memory_space<vmem>>, %arg7: memref<8x96xf32, #tpu.memory_space<vmem>>) attributes {dimension_semantics = [#tpu.dimension_semantics<parallel>], iteration_bounds = array<i64: 1>, scalar_prefetch = 0 : i64, scratch_operands = 0 : i64, tpu.core_type = #tpu.core_type<tc>, window_params = [{pipeline_mode = #tpu.pipeline_mode<synchronous>, transform_indices = @transform_0, window_bounds = array<i64: 32, 64>}, {pipeline_mode = #tpu.pipeline_mode<synchronous>, transform_indices = @transform_1, window_bounds = array<i64: 32, 32>}, {transform_indices = @transform_2, window_bounds = array<i64: 8, 32>}, {transform_indices = @transform_3, window_bounds = array<i64: 8, 32>}, {transform_indices = @transform_4, window_bounds = array<i64: 8, 32>}, {transform_indices = @transform_5, window_bounds = array<i64: 8, 32, 32>}, {transform_indices = @transform_6, window_bounds = array<i64: 8, 96>}]} {
    %c0 = arith.constant 0 : index
    %c0_0 = arith.constant 0 : index
    %0 = vector.load %arg3[%c0, %c0_0] : memref<8x32xf32, #tpu.memory_space<vmem>>, vector<8x32xf32>
    %c0_1 = arith.constant 0 : index
    %c0_2 = arith.constant 0 : index
    %1 = vector.load %arg4[%c0_1, %c0_2] : memref<8x32xf32, #tpu.memory_space<vmem>>, vector<8x32xf32>
    %c0_3 = arith.constant 0 : index
    %c0_4 = arith.constant 0 : index
    %2 = vector.load %arg5[%c0_3, %c0_4] : memref<8x32xf32, #tpu.memory_space<vmem>>, vector<8x32xf32>
    %c0_5 = arith.constant 0 : index
    %c0_6 = arith.constant 0 : index
    %3 = vector.load %arg1[%c0_5, %c0_6] : memref<32x64xf32, #tpu.memory_space<vmem>>, vector<32x64xf32>
    %c0_7 = arith.constant 0 : index
    %c0_8 = arith.constant 0 : index
    %4 = vector.load %arg2[%c0_7, %c0_8] : memref<32x32xf32, #tpu.memory_space<vmem>>, vector<32x32xf32>
    %c0_9 = arith.constant 0 : index
    %c0_10 = arith.constant 0 : index
    %c0_11 = arith.constant 0 : index
    %5 = vector.load %arg6[%c0_9, %c0_10, %c0_11] : memref<8x32x32xf32, #tpu.memory_space<vmem>>, vector<8x32x32xf32>
    %6 = vector.shape_cast %2 : vector<8x32xf32> to vector<8x1x32xf32>
    %7 = vector.broadcast %6 : vector<8x1x32xf32> to vector<8x32x32xf32>
    %8 = arith.mulf %5, %7 : vector<8x32x32xf32>
    %cst = arith.constant dense<0.000000e+00> : vector<8x32xf32>
    %9 = vector.multi_reduction <add>, %8, %cst [2] : vector<8x32x32xf32> to vector<8x32xf32>
    %cst_12 = arith.constant dense<0.000000e+00> : vector<8x64xf32>
    %10 = tpu.matmul %2, %3, %cst_12 {dimension_numbers = #tpu.dot_dimension_numbers<[1], [0], [0], [1], [0, 0, 1, 1], [], []>} : vector<8x32xf32>, vector<32x64xf32>, vector<8x64xf32> -> vector<8x64xf32>
    %11 = vector.extract_strided_slice %10 {offsets = [0, 0], sizes = [8, 32], strides = [1, 1]} : vector<8x64xf32> to vector<8x32xf32>
    %12 = vector.extract_strided_slice %10 {offsets = [0, 32], sizes = [8, 32], strides = [1, 1]} : vector<8x64xf32> to vector<8x32xf32>
    %cst_13 = arith.constant dense<0.000000e+00> : vector<8x32xf32>
    %13 = tpu.matmul %9, %4, %cst_13 {dimension_numbers = #tpu.dot_dimension_numbers<[1], [0], [0], [1], [0, 0, 1, 1], [], []>} : vector<8x32xf32>, vector<32x32xf32>, vector<8x32xf32> -> vector<8x32xf32>
    %14 = arith.addf %0, %11 : vector<8x32xf32>
    %15 = arith.subf %1, %13 : vector<8x32xf32>
    %16 = arith.addf %15, %12 : vector<8x32xf32>
    %17 = tpu.concatenate %14, %15, %16 in 1 : vector<8x32xf32>, vector<8x32xf32>, vector<8x32xf32> -> vector<8x96xf32>
    %c0_14 = arith.constant 0 : index
    %c0_15 = arith.constant 0 : index
    %18 = vector.load %arg7[%c0_14, %c0_15] : memref<8x96xf32, #tpu.memory_space<vmem>>, vector<8x96xf32>
    tpu.vector_store %arg7[%c0_14, %c0_15], %17 {strides = array<i32>} : memref<8x96xf32, #tpu.memory_space<vmem>>, vector<8x96xf32>,
    return
  }
  func.func @transform_0(%arg0: i32) -> (i32, i32) {
    %c0_i32 = arith.constant 0 : i32
    %c0_i32_0 = arith.constant 0 : i32
    %c0_i32_1 = arith.constant 0 : i32
    return %c0_i32, %c0_i32_0 : i32, i32
  }
  func.func @transform_1(%arg0: i32) -> (i32, i32) {
    %c0_i32 = arith.constant 0 : i32
    %c0_i32_0 = arith.constant 0 : i32
    %c0_i32_1 = arith.constant 0 : i32
    return %c0_i32, %c0_i32_0 : i32, i32
  }
  func.func @transform_2(%arg0: i32) -> (i32, i32) {
    %c0_i32 = arith.constant 0 : i32
    %c0_i32_0 = arith.constant 0 : i32
    return %arg0, %c0_i32 : i32, i32
  }
  func.func @transform_3(%arg0: i32) -> (i32, i32) {
    %c0_i32 = arith.constant 0 : i32
    %c0_i32_0 = arith.constant 0 : i32
    return %arg0, %c0_i32 : i32, i32
  }
  func.func @transform_4(%arg0: i32) -> (i32, i32) {
    %c0_i32 = arith.constant 0 : i32
    %c0_i32_0 = arith.constant 0 : i32
    return %arg0, %c0_i32 : i32, i32
  }
  func.func @transform_5(%arg0: i32) -> (i32, i32, i32) {
    %c0_i32 = arith.constant 0 : i32
    %c0_i32_0 = arith.constant 0 : i32
    %c0_i32_1 = arith.constant 0 : i32
    return %arg0, %c0_i32, %c0_i32_0 : i32, i32, i32
  }
  func.func @transform_6(%arg0: i32) -> (i32, i32) {
    %c0_i32 = arith.constant 0 : i32
    %c0_i32_0 = arith.constant 0 : i32
    return %arg0, %c0_i32 : i32, i32
  }
}

</mosaic_0001>

<bundles_post_ra>
// kernel: tpu_custom_call.1
= control target key start
LH: loop header
LB: loop body
LE: loop exit
PB: predicated region body
PF: predicated region fallthrough
CT: control target
= control target key end

     0   :  { %11 = vsyncpa [#allocation3], 0  ;;  %s1214_s0 = inlined_call_operand.hbm [shape: f32[32,64], index: 0, kind: input, shape index: {}]   ;;  %s1215_s1 = inlined_call_operand.hbm [shape: f32[32,32], index: 1, kind: input, shape index: {}]   ;;  %s1216_s2 = inlined_call_operand.hbm [shape: f32[8,32], index: 2, kind: input, shape index: {}]   ;;  %s1217_s3 = inlined_call_operand.vmem [shape: f32[8,32], index: 3, kind: input, shape index: {}]   ;;  %s1218_s4 = inlined_call_operand.hbm [shape: f32[8,32], index: 4, kind: input, shape index: {}]   ;;  %s1219_s5 = inlined_call_operand.hbm [shape: f32[8,32,32], index: 5, kind: input, shape index: {}]   ;;  %s1220_s6 = inlined_call_operand.hbm [shape: f32[8,96], index: 6, kind: output, shape index: {}]  }
   0x1   :  { %12 = vsyncpa [#allocation6], 0 }
   0x2   :  { %13 = vsyncpa [#allocation9], 0 }
   0x3   :  { %14 = vsyncpa [#allocation4], 0  ;;  %s939_s21 = smov [#allocation5]   ;;  %s940_s23 = smov [#allocation8]  }
   0x4   :  { %s32_s22 = sshll.u32 %s939_s21, 4  ;;  %s57_s24 = sshll.u32 %s940_s23, 4  ;;  %s33_s22 = int_to_ptr.vmem [resolvable:$true] %s32_s22  ;;  %s58_s24 = int_to_ptr.vmem [resolvable:$true] %s57_s24 }
   0x5   :  { %s799_s27 = scalar_lea.hbm %s1215_s1, 512 }
   0x6   :  { %p800_p0 = scmp.ne.s32.totalorder %s1215_s1, %s799_s27  ;;  %p803_p1 = scmp.lt.u32.totalorder %s799_s27, %s1215_s1 }
   0x8   :  { %p805_p2 = pnand %p803_p1, %p800_p0 }
   0xa   :  { %808 = shalt.err (!%p805_p2)
}
   0xb   :  { %s809_s8 = scalar_lea.vmem %s33_s22, 512  ;;  %p814_p4 = scmp.lt.s32.totalorder %s33_s22, %s33_s22 }
   0xc   :  { %p810_p3 = scmp.ne.s32.totalorder %s33_s22, %s809_s8  ;;  %p815_p5 = scmp.lt.s32.totalorder %s809_s8, %s809_s8 }
   0xe   :  { %p816_p6 = por %p815_p5, %p814_p4 }
  0x10   :  { %p817_p7 = pnand %p816_p6, %p810_p3 }
  0x12   :  { %820 = shalt.err (!%p817_p7)
}
  0x13   :  { %s941_s9 = smov 128   ;;  %s942_s10 = smov 8  }
  0x14   :  { %38 = dma.hbm_to_vmem [thread:$0]  %s1215_s1, 512, %s33_s22, [#allocation6], %s941_s9, %s941_s9, %s942_s10  }
  0x15   :  { %s821_s15 = scalar_lea.hbm %s1218_s4, 128 }
  0x16   :  { %p822_p8 = scmp.ne.s32.totalorder %s1218_s4, %s821_s15  ;;  %p825_p9 = scmp.lt.u32.totalorder %s821_s15, %s1218_s4 }
  0x18   :  { %p827_p10 = pnand %p825_p9, %p822_p8 }
  0x1a   :  { %830 = shalt.err (!%p827_p10)
}
  0x1b   :  { %s831_s20 = scalar_lea.vmem %s58_s24, 128  ;;  %p836_p12 = scmp.lt.s32.totalorder %s58_s24, %s58_s24 }
  0x1c   :  { %p832_p11 = scmp.ne.s32.totalorder %s58_s24, %s831_s20  ;;  %p837_p13 = scmp.lt.s32.totalorder %s831_s20, %s831_s20 }
  0x1e   :  { %p838_p0 = por %p837_p13, %p836_p12 }
  0x20   :  { %p839_p1 = pnand %p838_p0, %p832_p11 }
  0x22   :  { %842 = shalt.err (!%p839_p1)
}
  0x23   :  { %60 = dma.hbm_to_vmem [thread:$0]  %s1218_s4, 128, %s58_s24, [#allocation9]  }
  0x24   :  { %s943_s22 = smov [#allocation2]   ;;  %s944_s25 = smov [#allocation7]  }
  0x25   :  { %s20_s23 = sshll.u32 %s943_s22, 4  ;;  %s45_s26 = sshll.u32 %s944_s25, 4  ;;  %s21_s23 = int_to_ptr.vmem [resolvable:$true] %s20_s23  ;;  %s46_s26 = int_to_ptr.vmem [resolvable:$true] %s45_s26 }
  0x26   :  { %s843_s29 = scalar_lea.hbm %s1214_s0, 512 }
  0x27   :  { %p844_p2 = scmp.ne.s32.totalorder %s1214_s0, %s843_s29  ;;  %p847_p3 = scmp.lt.u32.totalorder %s843_s29, %s1214_s0 }
  0x29   :  { %p849_p4 = pnand %p847_p3, %p844_p2 }
  0x2b   :  { %852 = shalt.err (!%p849_p4)
}
  0x2c   :  { %s853_s4 = scalar_lea.vmem %s21_s23, 512  ;;  %p858_p6 = scmp.lt.s32.totalorder %s21_s23, %s21_s23 }
  0x2d   :  { %p854_p5 = scmp.ne.s32.totalorder %s21_s23, %s853_s4  ;;  %p859_p7 = scmp.lt.s32.totalorder %s853_s4, %s853_s4 }
  0x2f   :  { %p860_p8 = por %p859_p7, %p858_p6 }
  0x31   :  { %p861_p9 = pnand %p860_p8, %p854_p5 }
  0x33   :  { %864 = shalt.err (!%p861_p9)
}
  0x34   :  { %26 = dma.hbm_to_vmem [thread:$0]  %s1214_s0, 512, %s21_s23, [#allocation3], %s941_s9, %s941_s9, %s942_s10  }
  0x35   :  { %s865_s15 = scalar_lea.hbm %s1216_s2, 128 }
  0x36   :  { %p866_p10 = scmp.ne.s32.totalorder %s1216_s2, %s865_s15  ;;  %p869_p11 = scmp.lt.u32.totalorder %s865_s15, %s1216_s2 }
  0x38   :  { %p871_p12 = pnand %p869_p11, %p866_p10 }
  0x3a   :  { %874 = shalt.err (!%p871_p12)
}
  0x3b   :  { %s875_s20 = scalar_lea.vmem %s46_s26, 128  ;;  %p880_p0 = scmp.lt.s32.totalorder %s46_s26, %s46_s26 }
  0x3c   :  { %p876_p13 = scmp.ne.s32.totalorder %s46_s26, %s875_s20  ;;  %p881_p1 = scmp.lt.s32.totalorder %s875_s20, %s875_s20 }
  0x3e   :  { %p882_p2 = por %p881_p1, %p880_p0 }
  0x40   :  { %p883_p3 = pnand %p882_p2, %p876_p13 }
  0x42   :  { %886 = shalt.err (!%p883_p3)
}
  0x43   :  { %48 = dma.hbm_to_vmem [thread:$0]  %s1216_s2, 128, %s46_s26, [#allocation6]  }
  0x44   :  { %s945_s21 = smov [#allocation10]   ;;  %s887_s27 = scalar_lea.hbm %s1219_s5, 4096 }
  0x45   :  { %s66_s22 = sshll.u32 %s945_s21, 4  ;;  %p888_p4 = scmp.ne.s32.totalorder %s1219_s5, %s887_s27  ;;  %s67_s22 = int_to_ptr.vmem [resolvable:$true] %s66_s22 }
  0x46   :  { %p891_p5 = scmp.lt.u32.totalorder %s887_s27, %s1219_s5 }
  0x48   :  { %p893_p6 = pnand %p891_p5, %p888_p4 }
  0x4a   :  { %896 = shalt.err (!%p893_p6)
}
  0x4b   :  { %s897_s8 = scalar_lea.vmem %s67_s22, 4096  ;;  %p902_p8 = scmp.lt.s32.totalorder %s67_s22, %s67_s22 }
  0x4c   :  { %p898_p7 = scmp.ne.s32.totalorder %s67_s22, %s897_s8  ;;  %p903_p9 = scmp.lt.s32.totalorder %s897_s8, %s897_s8 }
  0x4e   :  { %p904_p10 = por %p903_p9, %p902_p8 }
  0x50   :  { %p905_p11 = pnand %p904_p10, %p898_p7 }
  0x52   :  { %908 = shalt.err (!%p905_p11)
}
  0x53   :  { %72 = dma.hbm_to_vmem [thread:$0]  %s1219_s5, 4096, %s67_s22, [#allocation9], %s941_s9, %s941_s9, %s942_s10  }
  0x54   :  { %931 = dma.done.wait [#allocation3], 512  }
  0x55   :  { %932 = vsyncadd [#allocation3], 4294966784 }
  0x56   :  { %933 = dma.done.wait [#allocation6], 640  }
  0x57   :  { %934 = vsyncadd [#allocation6], 4294966656 }
  0x58   :  { %935 = dma.done.wait [#allocation9], 4224  }
  0x59   :  { %936 = vsyncadd [#allocation9], 4294963072  ;;  %v136_v0 = vlaneseq  ;;  %v946_v1 = vmov 1966171168   ;;  %v947_v3 = vmov 0.0|0.0   ;;  %vm948_vm0 = vmmov 0  }
  0x5a   :  { %v134_v2 = vunpack.c.l.s4 %v946_v1  ;;  %771 = vmatprep.subr.bf16.mxu0 %v947_v3  ;;  %777 = vmatprep.subr.bf16.mxu1 %v947_v3  ;;  %v949_v5 = vmov 0.0   ;;  %v1071_v10 = vld [vmem:[#allocation8] sm:$0xff]  ;;  %v99_v15 = vld [vmem:[#allocation10] sm:$0xff]  ;;  %v100_v16 = vld [vmem:[#allocation10 + $0x8] sm:$0xff]  ;;  %vm253_vm1 = vcmask 261120   ;;  %vm465_vm2 = vcmask 130112  }
  0x5b   :  { %v1060_v4 = vshrl.u32 %v136_v0, 7  ;;  %757 = vmatprep.mubr.msk.f32.mxu0 %vm948_vm0, %v949_v5  ;;  %v1062_v6 = vand.u32 127, %v136_v0  ;;  %768 = vmatprep.mubr.msk.f32.mxu1 %vm948_vm0, %v949_v5  ;;  %v103_v19 = vld [vmem:[#allocation10 + $0x20] sm:$0xff]  ;;  %v104_v20 = vld [vmem:[#allocation10 + $0x28] sm:$0xff]  ;;  %v101_v24 = vld [vmem:[#allocation10 + $0x10] sm:$0xff]  ;;  %v132_v46 = vcombine.high %v1071_v10, %v1071_v10  ;;  %vm472_vm3 = vcmask 195712  }
  0x5c   :  { %v135_v7 = vunpack.c.0.s8 %v134_v2  ;;  %v105_v29 = vld [vmem:[#allocation10 + $0x30] sm:$0xff]  ;;  %v102_v33 = vld [vmem:[#allocation10 + $0x18] sm:$0xff]  ;;  %v108_v37 = vld [vmem:[#allocation10 + $0x48] sm:$0xff]  ;;  %vm479_vm4 = vcmask 261312   ;;  %vm614_vm5 = vcmask 1041409   ;;  %vm616_vm6 = vcmask 1042434  }
  0x5d   :  { %v1066_v8 = vsub.s32 %v1062_v6, %v1060_v4  ;;  %v1076_v12 = vsub.s32 0, %v1060_v4  ;;  %v91_v40 = vld [vmem:[#allocation2] sm:$0xff]  ;;  %v92_v41 = vld [vmem:[#allocation2 + $0x8] sm:$0xff]  ;;  %v107_v42 = vld [vmem:[#allocation10 + $0x40] sm:$0xff]  ;;  %v460_v5 = vadd.s32 4294967288, %v1062_v6  ;;  %vm618_vm7 = vcmask 1043459  }
  0x5e   :  { %v1069_v9 = vsub.s32 %v135_v7, %v1060_v4  ;;  %v93_v47 = vld [vmem:[#allocation2 + $0x10] sm:$0xff]  ;;  %v94_v48 = vld [vmem:[#allocation2 + $0x18] sm:$0xff]  ;;  %v106_v49 = vld [vmem:[#allocation10 + $0x38] sm:$0xff]  ;;  %v772_v50 = vpack.c.bf16 %v92_v41, %v91_v40  ;;  %vm620_vm8 = vcmask 1044484   ;;  %vm622_vm9 = vcmask 1045509   ;;  %s950_s5 = smov 96  }
  0x5f   :  { %v109_v53 = vld [vmem:[#allocation10 + $0x50] sm:$0xff]  ;;  %v775_v54 = vpack.c.bf16 %v94_v48, %v93_v47  ;;  %v111_v59 = vld [vmem:[#allocation10 + $0x60] sm:$0xff]  ;;  %v112_v62 = vld [vmem:[#allocation10 + $0x68] sm:$0xff]  ;;  %vm624_vm10 = vcmask 1046534   ;;  %vm626_vm11 = vcmask 1047559   ;;  %s951_s11 = smov 32  }
  0x60   :  { %v139_v11 = vrot.slane %v1071_v10, %v1069_v9  ;;  %773 = vmatpush3.bf16.msra.mxu0 %v772_v50  ;;  %v146_v58 = vrot.slane %v132_v46, %v1069_v9  ;;  %v110_v2 = vld [vmem:[#allocation10 + $0x58] sm:$0xff]  ;;  %v123_v47 = vld [vmem:[#allocation10 + $0xc0] sm:$0xff]  ;;  %v124_v50 = vld [vmem:[#allocation10 + $0xc8] sm:$0xff]  ;;  %s952_s4 = smov 64   ;;  %s953_s24 = smov [#allocation11]   ;;  %vm716_vm12 = vcmask 523264  }
  0x61   :  { %774 = vmatprep.subr.bf16.mxu0 %v947_v3  ;;  %v118_v40 = vld [vmem:[#allocation10 + $0x98] sm:$0xff]  ;;  %s726_s12 = sshll.u32 %s953_s24, 4  ;;  %vm718_vm13 = vcmask 785408   ;;  %s727_s12 = int_to_ptr.vmem [resolvable:$true] %s726_s12 }
  0x62   :  { %v155_v13 = vrot.slane %v139_v11, %v1069_v9  ;;  %v147_v14 = vcombine.high %v139_v11, %v139_v11  ;;  %v162_v1 = vrot.slane %v146_v58, %v1069_v9  ;;  %p914_p13 = scmp.lt.s32.totalorder %s727_s12, %s727_s12 }
  0x64   :  { %v184_v17 = vrot.slane %v155_v13, %v1076_v12  ;;  %v169_v18 = vrot.slane %v147_v14, %v1069_v9  ;;  %v177_v28 = vcombine.high %v155_v13, %v155_v13  ;;  %776 = vmatpush3.bf16.msra.mxu0 %v775_v54  ;;  %v113_v13 = vld [vmem:[#allocation10 + $0x70] sm:$0xff]  ;;  %v1104_v14 = vsub.s32 %v460_v5, %v1060_v4  ;;  %v122_v54 = vld [vmem:[#allocation10 + $0xb8] sm:$0xff] }
  0x65   :  { %v126_v5 = vld [vmem:[#allocation10 + $0xd8] sm:$0xff] }
  0x66   :  { %v221_v21 = vmul.f32 %v184_v17, %v99_v15  ;;  %v188_v22 = vrot.slane %v169_v18, %v1076_v12  ;;  %v222_v23 = vmul.f32 %v184_v17, %v100_v16  ;;  %v223_v32 = vmul.f32 %v184_v17, %v101_v24 }
  0x67   :  { %v192_v36 = vrot.slane %v177_v28, %v1076_v12  ;;  %v224_v39 = vmul.f32 %v184_v17, %v102_v33  ;;  %v179_v45 = vcombine.high %v169_v18, %v169_v18  ;;  %758 = vmatmul.mubr.msk.f32.vlgmr.msra.gmra.mrb[0].mxu0 %vm253_vm1, %v1071_v10  ;;  %v467_v15 = vadd.s32 4294967280, %v1062_v6  ;;  %v114_v28 = vld [vmem:[#allocation10 + $0x78] sm:$0xff] }
  0x68   :  { %v254_v25 = vsel %vm253_vm1, %v221_v21, 0.0  ;;  %v225_v26 = vmul.f32 %v188_v22, %v103_v19  ;;  %v226_v27 = vmul.f32 %v188_v22, %v104_v20  ;;  %v257_v31 = vsel %vm253_vm1, %v222_v23, 0.0  ;;  %v115_v20 = vld [vmem:[#allocation10 + $0x80] sm:$0xff]  ;;  %v116_v23 = vld [vmem:[#allocation10 + $0x88] sm:$0xff] }
  0x69   :  { %255 = vadd.xlane.f32.xlu0 %v254_v25  ;;  %v227_v35 = vmul.f32 %v188_v22, %v105_v29  ;;  %v260_v38 = vsel %vm253_vm1, %v223_v32, 0.0  ;;  %v230_v44 = vmul.f32 %v192_v36, %v108_v37  ;;  %v263_v51 = vsel %vm253_vm1, %v224_v39, 0.0  ;;  %v117_v32 = vld [vmem:[#allocation10 + $0x90] sm:$0xff]  ;;  %v120_v37 = vld [vmem:[#allocation10 + $0xa8] sm:$0xff] }
  0x6a   :  { %v266_v30 = vsel %vm253_vm1, %v225_v26, 0.0  ;;  %v269_v34 = vsel %vm253_vm1, %v226_v27, 0.0  ;;  %v229_v52 = vmul.f32 %v192_v36, %v107_v42  ;;  %v228_v56 = vmul.f32 %v188_v22, %v106_v49 }
  0x6b   :  { %267 = vadd.xlane.f32.xlu1 %v266_v30  ;;  %v272_v43 = vsel %vm253_vm1, %v227_v35, 0.0  ;;  %v281_v55 = vsel %vm253_vm1, %v230_v44, 0.0  ;;  %v196_v57 = vrot.slane %v179_v45, %v1076_v12  ;;  %v231_v61 = vmul.f32 %v192_v36, %v109_v53  ;;  %v119_v35 = vld [vmem:[#allocation10 + $0xa0] sm:$0xff] }
  0x6c   :  { %v278_v60 = vsel %vm253_vm1, %v229_v52, 0.0  ;;  %v275_v63 = vsel %vm253_vm1, %v228_v56, 0.0  ;;  %v232_v17 = vmul.f32 %v192_v36, %v110_v2  ;;  %v200_v18 = vrot.slane %v162_v1, %v1076_v12 }
  0x6d   :  { %258 = vadd.xlane.f32.xlu0 %v257_v31  ;;  %v233_v0 = vmul.f32 %v196_v57, %v111_v59  ;;  %v284_v7 = vsel %vm253_vm1, %v231_v61, 0.0  ;;  %v234_v11 = vmul.f32 %v196_v57, %v112_v62  ;;  %v148_v19 = vcombine.high %v146_v58, %v146_v58  ;;  %v127_v61 = vld [vmem:[#allocation10 + $0xe0] sm:$0xff] }
  0x6e   :  { %v1110_v21 = vsub.s32 %v467_v15, %v1060_v4  ;;  %v235_v22 = vmul.f32 %v196_v57, %v113_v13  ;;  %v474_v24 = vadd.s32 4294967272, %v1062_v6  ;;  %v287_v25 = vsel %vm253_vm1, %v232_v17, 0.0  ;;  %v129_v13 = vld [vmem:[#allocation10 + $0xf0] sm:$0xff] }
  0x6f   :  { %270 = vadd.xlane.f32.xlu1 %v269_v34  ;;  %v290_v16 = vsel %vm253_vm1, %v233_v0, 0.0  ;;  %v293_v10 = vsel %vm253_vm1, %v234_v11, 0.0  ;;  %v237_v26 = vmul.f32 %v200_v18, %v115_v20  ;;  %v176_v27 = vrot.slane %v148_v19, %v1069_v9  ;;  %v128_v0 = vld [vmem:[#allocation10 + $0xe8] sm:$0xff] }
  0x70   :  { %v1117_v29 = vsub.s32 %v474_v24, %v1060_v4  ;;  %v296_v30 = vsel %vm253_vm1, %v235_v22, 0.0  ;;  %v238_v31 = vmul.f32 %v200_v18, %v116_v23  ;;  %v236_v34 = vmul.f32 %v196_v57, %v114_v28  ;;  %v125_v57 = vld [vmem:[#allocation10 + $0xd0] sm:$0xff]  ;;  %v96_v24 = vld [vmem:[#allocation5 + $0x8] sm:$0xff] }
  0x71   :  { %261 = vadd.xlane.f32.xlu0 %v260_v38  ;;  %v302_v33 = vsel %vm253_vm1, %v237_v26, 0.0  ;;  %v204_v6 = vrot.slane %v176_v27, %v1076_v12  ;;  %v239_v9 = vmul.f32 %v200_v18, %v117_v32  ;;  %v178_v39 = vcombine.high %v162_v1, %v162_v1  ;;  %v95_v23 = vld [vmem:[#allocation5] sm:$0xff]  ;;  %v97_v26 = vld [vmem:[#allocation5 + $0x10] sm:$0xff] }
  0x72   :  { %v305_v36 = vsel %vm253_vm1, %v238_v31, 0.0  ;;  %v299_v4 = vsel %vm253_vm1, %v236_v34, 0.0  ;;  %v240_v45 = vmul.f32 %v200_v18, %v118_v40  ;;  %v180_v53 = vcombine.high %v176_v27, %v176_v27  ;;  %v98_v27 = vld [vmem:[#allocation5 + $0x18] sm:$0xff] }
  0x73   :  { %273 = vadd.xlane.f32.xlu1 %v272_v43  ;;  %v241_v38 = vmul.f32 %v204_v6, %v119_v35  ;;  %v308_v41 = vsel %vm253_vm1, %v239_v9, 0.0  ;;  %v242_v42 = vmul.f32 %v204_v6, %v120_v37  ;;  %v121_v43 = vld [vmem:[#allocation10 + $0xb0] sm:$0xff]  ;;  %v208_v46 = vrot.slane %v178_v39, %v1076_v12 }
  0x74   :  { %v243_v49 = vmul.f32 %v204_v6, %v121_v43  ;;  %v244_v59 = vmul.f32 %v204_v6, %v122_v54  ;;  %v781_v28 = vpack.c.bf16 %v98_v27, %v97_v26 }
  0x75   :  { %264 = vadd.xlane.f32.xlu0 %v263_v51  ;;  %v314_v44 = vsel %vm253_vm1, %v241_v38, 0.0  ;;  %v317_v48 = vsel %vm253_vm1, %v242_v42, 0.0  ;;  %v311_v51 = vsel %vm253_vm1, %v240_v45, 0.0  ;;  %v245_v52 = vmul.f32 %v208_v46, %v123_v47 }
  0x76   :  { %v246_v56 = vmul.f32 %v208_v46, %v124_v50  ;;  %v323_v1 = vsel %vm253_vm1, %v244_v59, 0.0 }
  0x77   :  { %282 = vadd.xlane.f32.xlu1 %v281_v55  ;;  %v320_v55 = vsel %vm253_vm1, %v243_v49, 0.0  ;;  %v326_v58 = vsel %vm253_vm1, %v245_v52, 0.0 }
  0x78   :  { %v329_v62 = vsel %vm253_vm1, %v246_v56, 0.0 }
  0x79   :  { %279 = vadd.xlane.f32.xlu0 %v278_v60  ;;  %v212_v60 = vrot.slane %v180_v53, %v1076_v12  ;;  %v248_v12 = vmul.f32 %v208_v46, %v126_v5 }
  0x7b   :  { %276 = vadd.xlane.f32.xlu1 %v275_v63  ;;  %v247_v63 = vmul.f32 %v208_v46, %v125_v57  ;;  %v249_v2 = vmul.f32 %v212_v60, %v127_v61  ;;  %v250_v11 = vmul.f32 %v212_v60, %v128_v0  ;;  %v251_v18 = vmul.f32 %v212_v60, %v129_v13 }
  0x7c   :  { %v335_v19 = vsel %vm253_vm1, %v248_v12, 0.0 }
  0x7d   :  { %285 = vadd.xlane.f32.xlu0 %v284_v7  ;;  %v332_v7 = vsel %vm253_vm1, %v247_v63, 0.0  ;;  %v338_v15 = vsel %vm253_vm1, %v249_v2, 0.0  ;;  %v341_v17 = vsel %vm253_vm1, %v250_v11, 0.0 }
  0x7f   :  { %291 = vadd.xlane.f32.xlu1 %v290_v16  ;;  %v130_v16 = vld [vmem:[#allocation10 + $0xf8] sm:$0xff] }
  0x80   :  { %v252_v20 = vmul.f32 %v212_v60, %v130_v16 }
  0x81   :  { %294 = vadd.xlane.f32.xlu0 %v293_v10  ;;  %v344_v10 = vsel %vm253_vm1, %v251_v18, 0.0 }
  0x82   :  { %v347_v22 = vsel %vm253_vm1, %v252_v20, 0.0 }
  0x83   :  { %288 = vadd.xlane.f32.xlu1 %v287_v25  ;;  %v778_v25 = vpack.c.bf16 %v96_v24, %v95_v23 }
  0x85   :  { %297 = vadd.xlane.f32.xlu0 %v296_v30  ;;  %779 = vmatpush3.bf16.msra.mxu1 %v778_v25 }
  0x86   :  { %780 = vmatprep.subr.bf16.mxu1 %v947_v3 }
  0x87   :  { %303 = vadd.xlane.f32.xlu1 %v302_v33 }
  0x89   :  { %306 = vadd.xlane.f32.xlu0 %v305_v36  ;;  %782 = vmatpush3.bf16.msra.mxu1 %v781_v28 }
  0x8b   :  { %300 = vadd.xlane.f32.xlu1 %v299_v4 }
  0x8d   :  { %309 = vadd.xlane.f32.xlu0 %v308_v41 }
  0x8f   :  { %315 = vadd.xlane.f32.xlu1 %v314_v44 }
  0x91   :  { %318 = vadd.xlane.f32.xlu0 %v317_v48 }
  0x93   :  { %312 = vadd.xlane.f32.xlu1 %v311_v51 }
  0x95   :  { %321 = vadd.xlane.f32.xlu0 %v320_v55 }
  0x97   :  { %327 = vadd.xlane.f32.xlu1 %v326_v58 }
  0x99   :  { %330 = vadd.xlane.f32.xlu0 %v329_v62 }
  0x9b   :  { %324 = vadd.xlane.f32.xlu1 %v323_v1 }
  0x9d   :  { %333 = vadd.xlane.f32.xlu0 %v332_v7 }
  0x9f   :  { %339 = vadd.xlane.f32.xlu1 %v338_v15 }
  0xa1   :  { %342 = vadd.xlane.f32.xlu0 %v341_v17 }
  0xa3   :  { %336 = vadd.xlane.f32.xlu1 %v335_v19 }
  0xa5   :  { %345 = vadd.xlane.f32.xlu0 %v344_v10 }
  0xa7   :  { %348 = vadd.xlane.f32.xlu1 %v347_v22 }
  0xf6   :  { %v256_v30 = vpop.xlane.xlu0 %255 }
  0xf7   :  { %v459_v33 = vrot.slane %v256_v30, %v1066_v8 }
  0xf8   :  { %v268_v31 = vpop.xlane.xlu1 %267 }
  0xf9   :  { %v484_v35 = vrot.slane %v268_v31, %v1066_v8 }
  0xfa   :  { %v259_v32 = vpop.xlane.xlu0 %258 }
  0xfb   :  { %v464_v34 = vrot.slane %v259_v32, %v1104_v14 }
  0xfc   :  { %v271_v6 = vpop.xlane.xlu1 %270 }
  0xfd   :  { %v466_v36 = vsel %vm465_vm2, %v464_v34, %v459_v33  ;;  %v488_v9 = vrot.slane %v271_v6, %v1104_v14 }
  0xfe   :  { %v262_v3 = vpop.xlane.xlu0 %261 }
  0xff   :  { %v489_v37 = vsel %vm465_vm2, %v488_v9, %v484_v35  ;;  %v471_v4 = vrot.slane %v262_v3, %v1110_v21 }
 0x100   :  { %v274_v38 = vpop.xlane.xlu1 %273 }
 0x101   :  { %v473_v39 = vsel %vm472_vm3, %v471_v4, %v466_v36  ;;  %v493_v40 = vrot.slane %v274_v38, %v1110_v21 }
 0x102   :  { %v265_v41 = vpop.xlane.xlu0 %264 }
 0x103   :  { %v494_v42 = vsel %vm472_vm3, %v493_v40, %v489_v37  ;;  %v478_v43 = vrot.slane %v265_v41, %v1117_v29 }
 0x104   :  { %v283_v44 = vpop.xlane.xlu1 %282 }
 0x105   :  { %v480_v45 = vsel %vm479_vm4, %v478_v43, %v473_v39  ;;  %v507_v47 = vrot.slane %v283_v44, %v1104_v14 }
 0x106   :  { %v280_v46 = vpop.xlane.xlu0 %279 }
 0x107   :  { %v503_v48 = vrot.slane %v280_v46, %v1066_v8 }
 0x108   :  { %v277_v49 = vpop.xlane.xlu1 %276 }
 0x109   :  { %v508_v50 = vsel %vm465_vm2, %v507_v47, %v503_v48  ;;  %v498_v51 = vrot.slane %v277_v49, %v1117_v29 }
 0x10a   :  { %v286_v52 = vpop.xlane.xlu0 %285 }
 0x10b   :  { %v499_v53 = vsel %vm479_vm4, %v498_v51, %v494_v42  ;;  %v512_v54 = vrot.slane %v286_v52, %v1110_v21 }
 0x10c   :  { %v615_v55 = vsel %vm614_vm5, %v499_v53, %v480_v45  ;;  %v292_v56 = vpop.xlane.xlu1 %291 }
 0x10d   :  { %v513_v57 = vsel %vm472_vm3, %v512_v54, %v508_v50  ;;  %v522_v59 = vrot.slane %v292_v56, %v1066_v8 }
 0x10e   :  { %v295_v58 = vpop.xlane.xlu0 %294 }
 0x10f   :  { %v526_v60 = vrot.slane %v295_v58, %v1104_v14 }
 0x110   :  { %v289_v61 = vpop.xlane.xlu1 %288 }
 0x111   :  { %v527_v62 = vsel %vm465_vm2, %v526_v60, %v522_v59  ;;  %v517_v63 = vrot.slane %v289_v61, %v1117_v29 }
 0x112   :  { %v298_v0 = vpop.xlane.xlu0 %297 }
 0x113   :  { %v518_v1 = vsel %vm479_vm4, %v517_v63, %v513_v57  ;;  %v531_v2 = vrot.slane %v298_v0, %v1110_v21 }
 0x114   :  { %v617_v5 = vsel %vm616_vm6, %v518_v1, %v615_v55  ;;  %v304_v7 = vpop.xlane.xlu1 %303  ;;  %v88_v1 = vld [vmem:[#allocation7] sm:$0xff] }
 0x115   :  { %v532_v11 = vsel %vm472_vm3, %v531_v2, %v527_v62  ;;  %v541_v15 = vrot.slane %v304_v7, %v1066_v8 }
 0x116   :  { %v307_v13 = vpop.xlane.xlu0 %306 }
 0x117   :  { %v545_v12 = vrot.slane %v307_v13, %v1104_v14 }
 0x118   :  { %v301_v16 = vpop.xlane.xlu1 %300 }
 0x119   :  { %v546_v17 = vsel %vm465_vm2, %v545_v12, %v541_v15  ;;  %v536_v18 = vrot.slane %v301_v16, %v1117_v29 }
 0x11a   :  { %v310_v19 = vpop.xlane.xlu0 %309 }
 0x11b   :  { %v537_v20 = vsel %vm479_vm4, %v536_v18, %v532_v11  ;;  %v550_v10 = vrot.slane %v310_v19, %v1110_v21 }
 0x11c   :  { %v619_v22 = vsel %vm618_vm7, %v537_v20, %v617_v5  ;;  %v316_v23 = vpop.xlane.xlu1 %315 }
 0x11d   :  { %v551_v24 = vsel %vm472_vm3, %v550_v10, %v546_v17  ;;  %v560_v26 = vrot.slane %v316_v23, %v1066_v8 }
 0x11e   :  { %v319_v25 = vpop.xlane.xlu0 %318 }
 0x11f   :  { %v564_v27 = vrot.slane %v319_v25, %v1104_v14 }
 0x120   :  { %v313_v28 = vpop.xlane.xlu1 %312 }
 0x121   :  { %v565_v30 = vsel %vm465_vm2, %v564_v27, %v560_v26  ;;  %v555_v31 = vrot.slane %v313_v28, %v1117_v29 }
 0x122   :  { %v322_v32 = vpop.xlane.xlu0 %321 }
 0x123   :  { %v556_v33 = vsel %vm479_vm4, %v555_v31, %v551_v24  ;;  %v569_v34 = vrot.slane %v322_v32, %v1110_v21 }
 0x124   :  { %v621_v6 = vsel %vm620_vm8, %v556_v33, %v619_v22  ;;  %v328_v35 = vpop.xlane.xlu1 %327 }
 0x125   :  { %v570_v36 = vsel %vm472_vm3, %v569_v34, %v565_v30  ;;  %v579_v3 = vrot.slane %v328_v35, %v1066_v8 }
 0x126   :  { %v331_v9 = vpop.xlane.xlu0 %330 }
 0x127   :  { %v583_v37 = vrot.slane %v331_v9, %v1104_v14 }
 0x128   :  { %v325_v4 = vpop.xlane.xlu1 %324 }
 0x129   :  { %v584_v38 = vsel %vm465_vm2, %v583_v37, %v579_v3  ;;  %v574_v39 = vrot.slane %v325_v4, %v1117_v29 }
 0x12a   :  { %v334_v40 = vpop.xlane.xlu0 %333 }
 0x12b   :  { %v575_v41 = vsel %vm479_vm4, %v574_v39, %v570_v36  ;;  %v588_v42 = vrot.slane %v334_v40, %v1110_v21 }
 0x12c   :  { %v623_v43 = vsel %vm622_vm9, %v575_v41, %v621_v6  ;;  %v340_v44 = vpop.xlane.xlu1 %339 }
 0x12d   :  { %v589_v45 = vsel %vm472_vm3, %v588_v42, %v584_v38  ;;  %v598_v47 = vrot.slane %v340_v44, %v1066_v8 }
 0x12e   :  { %v343_v46 = vpop.xlane.xlu0 %342 }
 0x12f   :  { %v602_v48 = vrot.slane %v343_v46, %v1104_v14 }
 0x130   :  { %v337_v49 = vpop.xlane.xlu1 %336 }
 0x131   :  { %v603_v50 = vsel %vm465_vm2, %v602_v48, %v598_v47  ;;  %v593_v51 = vrot.slane %v337_v49, %v1117_v29 }
 0x132   :  { %v346_v52 = vpop.xlane.xlu0 %345 }
 0x133   :  { %v594_v53 = vsel %vm479_vm4, %v593_v51, %v589_v45  ;;  %v607_v54 = vrot.slane %v346_v52, %v1110_v21  ;;  %v89_v21 = vld [vmem:[%s1217_s3] sm:$0xff]  ;;  %s909_s3 = scalar_lea.vmem %s727_s12, 128 }
 0x134   :  { %v349_v55 = vpop.xlane.xlu1 %348  ;;  %v625_v56 = vsel %vm624_vm10, %v594_v53, %v623_v43  ;;  %p910_p12 = scmp.ne.s32.totalorder %s727_s12, %s909_s3  ;;  %p915_p0 = scmp.lt.s32.totalorder %s909_s3, %s909_s3 }
 0x135   :  { %v608_v57 = vsel %vm472_vm3, %v607_v54, %v603_v50  ;;  %v612_v58 = vrot.slane %v349_v55, %v1117_v29 }
 0x136   :  { %p916_p1 = por %p915_p0, %p914_p13 }
 0x137   :  { %v613_v8 = vsel %vm479_vm4, %v612_v58, %v608_v57 }
 0x138   :  { %v627_v14 = vsel %vm626_vm11, %v613_v8, %v625_v56  ;;  %p917_p2 = pnand %p916_p1, %p910_p12 }
 0x139   :  { %769 = vmatmul.mubr.msk.f32.vlgmr.msra.gmra.mrb[0].mxu1 %vm253_vm1, %v627_v14 }
 0x13a   :  { %v418_v59 = vpop.f32.mrb[0].mxu0 }
 0x13b   :  { %703 = vrot.lane.b32.xlu0 %v418_v59, %s950_s5  ;;  %v759_v60 = vpop.f32.mrb[1].mxu0  ;;  %v700_v5 = vadd.f32 %v418_v59, %v88_v1 }
 0x1ad   :  { %v704_v0 = vpop.permute.xlu0 %703 }
 0x20c   :  { %v696_v61 = vpop.f32.mrb[0].mxu1 }
 0x20d   :  { %v701_v62 = vsub.f32 %v89_v21, %v696_v61  ;;  %v770_v63 = vpop.f32.mrb[1].mxu1 }
 0x20f   :  { %708 = vrot.lane.b32.xlu1 %v701_v62, %s951_s11  ;;  %v706_v29 = vadd.f32 %v704_v0, %v701_v62 }
 0x213   :  { %712 = vrot.lane.b32.xlu1 %v706_v29, %s952_s4 }
 0x281   :  { %v709_v2 = vpop.permute.xlu1 %708 }
 0x282   :  { %v715_v7 = vsel %vm253_vm1, %v700_v5, %v709_v2 }
 0x285   :  { %v713_v11 = vpop.permute.xlu1 %712 }
 0x286   :  { %v717_v13 = vsel %vm716_vm12, %v715_v7, %v713_v11 }
 0x287   :  { %719 = vst.msk [vmem:[#allocation11] sm:$0xff] %vm718_vm13, %v717_v13 }
 0x288   :  { %920 = shalt.err (!%p917_p2)
}
 0x289   :  { %s921_s15 = scalar_lea.hbm %s1220_s6, 128 }
 0x28a   :  { %p922_p3 = scmp.ne.s32.totalorder %s1220_s6, %s921_s15  ;;  %p925_p4 = scmp.lt.u32.totalorder %s921_s15, %s1220_s6 }
 0x28c   :  { %p927_p5 = pnand %p925_p4, %p922_p3 }
 0x28e   :  { %930 = shalt.err (!%p927_p5)
}
 0x28f   :  { %729 = dma.vmem_to_hbm [thread:$0]  %s727_s12, 128, %s1220_s6, [#allocation4]  }
 0x290   :  { %937 = dma.done.wait [#allocation4], 128  }
 0x291   :  { %938 = vsyncadd [#allocation4], 4294967168 }
 0x292   :  { %733 = vsyncpa [#allocation3], 1 }
 0x293   :  { %734 = vsyncpa [#allocation6], 1 }
 0x294   :  { %735 = vsyncpa [#allocation9], 1 }
 0x295   :  { %736 = vsyncpa [#allocation4], 1 }

</bundles_post_ra>
